<compile_context>
chip_gen: v7x
topology: tpu7x:2x2x1
jax: 0.10.0
libtpu: 0.0.40
codegen_flags: <defaults>
</compile_context>

<pallas_src>
import jax
import jax.numpy as jnp
from jax.experimental import pallas as pl
from jax.experimental.pallas import tpu as pltpu


# ------------------------------ Pallas kernel -------------------------------

def _uncertainty_kernel(x_ref, w1_ref, b1_ref, w2_ref, b2_ref, o_ref):
    # x_ref : (TM, D)   row tile of the input
    # w1_ref: (D, DH)   first Linear weight  (DH = D // 2)
    # b1_ref: (1, DH)
    # w2_ref: (1, DH)   second Linear weight, stored as a row vector
    # b2_ref: (1, 1)
    # o_ref : (TM, 1)   per-row uncertainty for this tile

    # Linear(D -> D//2) on the MXU, f32 accumulation, bias + ReLU on the VPU.
    h = jnp.dot(x_ref[...], w1_ref[...], preferred_element_type=jnp.float32)
    h = jnp.maximum(h + b1_ref[...], 0.0)

    # Dropout -> identity (eval-mode forward).

    # Linear(D//2 -> 1): lane-width-1 output, so use a VPU multiply +
    # lane reduction instead of a 1-wide MXU matmul (review feedback).
    s = jnp.sum(h * w2_ref[...], axis=-1, keepdims=True) + b2_ref[...]   # (TM, 1)

    # Numerically stable Softplus: max(x, 0) + log(1 + exp(-|x|))  (EUP exp/log).
    o_ref[...] = jnp.maximum(s, 0.0) + jnp.log(1.0 + jnp.exp(-jnp.abs(s)))


# --------------------------------- wrapper ----------------------------------

def uncertainty_estimator(x, params, *, block_rows=128):
    """Pallas forward of UncertaintyEstimator.

    x: [..., D]  ->  uncertainty: [...]   (matches .squeeze() for the usual
    [N, D] -> [N] case; leading dims are preserved).
    """
    d = x.shape[-1]
    lead_shape = x.shape[:-1]
    x2 = x.reshape(-1, d).astype(jnp.float32)
    n = x2.shape[0]

    w1 = params["w1"].astype(jnp.float32)                 # (D, DH)
    b1 = params["b1"].reshape(1, -1).astype(jnp.float32)  # (1, DH)
    w2 = params["w2"].reshape(1, -1).astype(jnp.float32)  # (1, DH)  row vector
    b2 = params["b2"].reshape(1, 1).astype(jnp.float32)   # (1, 1)
    dh = w1.shape[1]

    # Row-tile the batch; pad to a multiple of the tile so block shapes obey
    # the (8, 128)/full-dim rule. Padded rows are computed and sliced off.
    tm = block_rows
    n_pad = pl.cdiv(n, tm) * tm
    if n_pad != n:
        x2 = jnp.pad(x2, ((0, n_pad - n), (0, 0)))

    out = pl.pallas_call(
        _uncertainty_kernel,
        out_shape=jax.ShapeDtypeStruct((n_pad, 1), jnp.float32),
        grid=(n_pad // tm,),
        in_specs=[
            pl.BlockSpec((tm, d), lambda i: (i, 0)),   # x row tile
            pl.BlockSpec((d, dh), lambda i: (0, 0)),   # W1 (whole, VMEM-resident)
            pl.BlockSpec((1, dh), lambda i: (0, 0)),   # b1
            pl.BlockSpec((1, dh), lambda i: (0, 0)),   # W2 row
            pl.BlockSpec((1, 1), lambda i: (0, 0)),    # b2
        ],
        out_specs=pl.BlockSpec((tm, 1), lambda i: (i, 0)),
        compiler_params=pltpu.CompilerParams(
            dimension_semantics=("parallel",)),        # megacore-shardable on v7x
    )(x2, w1, b1, w2, b2)

    return out[:n, 0].reshape(lead_shape)


# ----------------------------------- main ------------------------------------

if __name__ == "__main__":
    embedding_dim = 32
    batch = 64

    key = jax.random.PRNGKey(0)
    kx, k1, k2 = jax.random.split(key, 3)

    d, dh = embedding_dim, embedding_dim // 2

    def xavier(k, shape):
        std = (2.0 / (shape[0] + shape[1])) ** 0.5
        return (std * jax.random.normal(k, shape)).astype(jnp.float32)

    params = {
        "w1": xavier(k1, (d, dh)),                 # Linear(D, D//2) weight [in, out]
        "b1": jnp.zeros((1, dh), jnp.float32),
        "w2": xavier(k2, (dh, 1)),                 # Linear(D//2, 1) weight [in, out]
        "b2": jnp.zeros((1, 1), jnp.float32),
    }

    x = jax.random.normal(kx, (batch, d), jnp.float32)

    u = uncertainty_estimator(x, params)
    jax.block_until_ready(u)

    # Plain-JAX reference for the same forward (dropout = identity in eval).
    h_ref = jnp.maximum(x @ params["w1"] + params["b1"], 0.0)
    s_ref = h_ref @ params["w2"] + params["b2"]
    u_ref = jax.nn.softplus(s_ref)[:, 0]

    assert u.shape == (batch,)
    assert bool(jnp.all(jnp.isfinite(u)))
    assert bool(jnp.allclose(u, u_ref, atol=1e-5, rtol=1e-5))
    print("KERNEL_OK")
</pallas_src>

<mosaic_0001>
module attributes {stable_mosaic.version = 11 : i64} {
  func.func @_uncertainty_kernel(%arg0: i32, %arg1: memref<128x32xf32, #tpu.memory_space<vmem>>, %arg2: memref<32x16xf32, #tpu.memory_space<vmem>>, %arg3: memref<1x16xf32, #tpu.memory_space<vmem>>, %arg4: memref<1x16xf32, #tpu.memory_space<vmem>>, %arg5: memref<1x1xf32, #tpu.memory_space<vmem>>, %arg6: memref<128x1xf32, #tpu.memory_space<vmem>>) attributes {dimension_semantics = [#tpu.dimension_semantics<parallel>], iteration_bounds = array<i64: 1>, scalar_prefetch = 0 : i64, scratch_operands = 0 : i64, tpu.core_type = #tpu.core_type<tc>, window_params = [{transform_indices = @transform_0, window_bounds = array<i64: 128, 32>}, {pipeline_mode = #tpu.pipeline_mode<synchronous>, transform_indices = @transform_1, window_bounds = array<i64: 32, 16>}, {pipeline_mode = #tpu.pipeline_mode<synchronous>, transform_indices = @transform_2, window_bounds = array<i64: 1, 16>}, {pipeline_mode = #tpu.pipeline_mode<synchronous>, transform_indices = @transform_3, window_bounds = array<i64: 1, 16>}, {pipeline_mode = #tpu.pipeline_mode<synchronous>, transform_indices = @transform_4, window_bounds = array<i64: 1, 1>}, {transform_indices = @transform_5, window_bounds = array<i64: 128, 1>}]} {
    %c0 = arith.constant 0 : index
    %c0_0 = arith.constant 0 : index
    %0 = vector.load %arg1[%c0, %c0_0] : memref<128x32xf32, #tpu.memory_space<vmem>>, vector<128x32xf32>
    %c0_1 = arith.constant 0 : index
    %c0_2 = arith.constant 0 : index
    %1 = vector.load %arg2[%c0_1, %c0_2] : memref<32x16xf32, #tpu.memory_space<vmem>>, vector<32x16xf32>
    %cst = arith.constant dense<0.000000e+00> : vector<128x16xf32>
    %2 = tpu.matmul %0, %1, %cst {dimension_numbers = #tpu.dot_dimension_numbers<[1], [0], [0], [1], [0, 0, 1, 1], [], []>} : vector<128x32xf32>, vector<32x16xf32>, vector<128x16xf32> -> vector<128x16xf32>
    %c0_3 = arith.constant 0 : index
    %c0_4 = arith.constant 0 : index
    %3 = vector.load %arg3[%c0_3, %c0_4] : memref<1x16xf32, #tpu.memory_space<vmem>>, vector<1x16xf32>
    %4 = vector.broadcast %3 : vector<1x16xf32> to vector<128x16xf32>
    %5 = arith.addf %2, %4 : vector<128x16xf32>
    %cst_5 = arith.constant 0.000000e+00 : f32
    %6 = vector.broadcast %cst_5 : f32 to vector<128x16xf32>
    %7 = arith.maximumf %5, %6 : vector<128x16xf32>
    %c0_6 = arith.constant 0 : index
    %c0_7 = arith.constant 0 : index
    %8 = vector.load %arg4[%c0_6, %c0_7] : memref<1x16xf32, #tpu.memory_space<vmem>>, vector<1x16xf32>
    %9 = vector.broadcast %8 : vector<1x16xf32> to vector<128x16xf32>
    %10 = arith.mulf %7, %9 : vector<128x16xf32>
    %cst_8 = arith.constant dense<0.000000e+00> : vector<128xf32>
    %11 = vector.multi_reduction <add>, %10, %cst_8 [1] : vector<128x16xf32> to vector<128xf32>
    %12 = vector.shape_cast %11 : vector<128xf32> to vector<128x1xf32>
    %c0_9 = arith.constant 0 : index
    %c0_10 = arith.constant 0 : index
    %13 = vector.load %arg5[%c0_9, %c0_10] : memref<1x1xf32, #tpu.memory_space<vmem>>, vector<1x1xf32>
    %14 = vector.broadcast %13 : vector<1x1xf32> to vector<128x1xf32>
    %15 = arith.addf %12, %14 : vector<128x1xf32>
    %cst_11 = arith.constant 0.000000e+00 : f32
    %16 = vector.broadcast %cst_11 : f32 to vector<128x1xf32>
    %17 = arith.maximumf %15, %16 : vector<128x1xf32>
    %18 = math.absf %15 : vector<128x1xf32>
    %cst_12 = arith.constant 0.000000e+00 : f32
    %19 = vector.broadcast %cst_12 : f32 to vector<128x1xf32>
    %20 = arith.subf %19, %18 : vector<128x1xf32>
    %21 = math.exp %20 : vector<128x1xf32>
    %cst_13 = arith.constant 1.000000e+00 : f32
    %22 = vector.broadcast %cst_13 : f32 to vector<128x1xf32>
    %23 = arith.addf %22, %21 : vector<128x1xf32>
    %24 = math.log %23 : vector<128x1xf32>
    %25 = arith.addf %17, %24 : vector<128x1xf32>
    %c0_14 = arith.constant 0 : index
    %c0_15 = arith.constant 0 : index
    %26 = vector.load %arg6[%c0_14, %c0_15] : memref<128x1xf32, #tpu.memory_space<vmem>>, vector<128x1xf32>
    tpu.vector_store %arg6[%c0_14, %c0_15], %25 {strides = array<i32>} : memref<128x1xf32, #tpu.memory_space<vmem>>, vector<128x1xf32>,
    return
  }
  func.func @transform_0(%arg0: i32) -> (i32, i32) {
    %c0_i32 = arith.constant 0 : i32
    %c0_i32_0 = arith.constant 0 : i32
    return %arg0, %c0_i32 : i32, i32
  }
  func.func @transform_1(%arg0: i32) -> (i32, i32) {
    %c0_i32 = arith.constant 0 : i32
    %c0_i32_0 = arith.constant 0 : i32
    %c0_i32_1 = arith.constant 0 : i32
    return %c0_i32, %c0_i32_0 : i32, i32
  }
  func.func @transform_2(%arg0: i32) -> (i32, i32) {
    %c0_i32 = arith.constant 0 : i32
    %c0_i32_0 = arith.constant 0 : i32
    %c0_i32_1 = arith.constant 0 : i32
    return %c0_i32, %c0_i32_0 : i32, i32
  }
  func.func @transform_3(%arg0: i32) -> (i32, i32) {
    %c0_i32 = arith.constant 0 : i32
    %c0_i32_0 = arith.constant 0 : i32
    %c0_i32_1 = arith.constant 0 : i32
    return %c0_i32, %c0_i32_0 : i32, i32
  }
  func.func @transform_4(%arg0: i32) -> (i32, i32) {
    %c0_i32 = arith.constant 0 : i32
    %c0_i32_0 = arith.constant 0 : i32
    %c0_i32_1 = arith.constant 0 : i32
    return %c0_i32, %c0_i32_0 : i32, i32
  }
  func.func @transform_5(%arg0: i32) -> (i32, i32) {
    %c0_i32 = arith.constant 0 : i32
    %c0_i32_0 = arith.constant 0 : i32
    return %arg0, %c0_i32 : i32, i32
  }
}

</mosaic_0001>

<bundles_post_ra>
// kernel: tpu_custom_call.1
= control target key start
LH: loop header
LB: loop body
LE: loop exit
PB: predicated region body
PF: predicated region fallthrough
CT: control target
= control target key end

     0   :  { %vm49_vm0 = vcmask 261120   ;;  %vm282_vm1 = vcmask 130048   ;;  %vm498_vm2 = vcmask 7168   ;;  %s979_s1 = inlined_call_operand.vmem [shape: f32[32,16], index: 1, kind: input, shape index: {}]   ;;  %s980_s0 = inlined_call_operand.vmem [shape: f32[128,32], index: 0, kind: input, shape index: {}]   ;;  %s981_s4 = inlined_call_operand.<no memory space> [shape: f32[1,1], index: 4, kind: input, shape index: {}]   ;;  %s982_s2 = inlined_call_operand.vmem [shape: f32[1,16], index: 2, kind: input, shape index: {}]   ;;  %s983_s3 = inlined_call_operand.vmem [shape: f32[1,16], index: 3, kind: input, shape index: {}]   ;;  %s984_s5 = inlined_call_operand.vmem [shape: f32[128,1], index: 5, kind: output, shape index: {}]  }
   0x1   :  { %v38_v0 = vld [vmem:[%s979_s1] sm:$0xff]  ;;  %v39_v1 = vld [vmem:[%s979_s1 + $0x8] sm:$0xff]  ;;  %v40_v2 = vld [vmem:[%s979_s1 + $0x10] sm:$0xff]  ;;  %v10_v22 = vstv %s981_s4 }
   0x2   :  { %v590_v3 = vpack.c.bf16 %v39_v1, %v38_v0  ;;  %v41_v4 = vld [vmem:[%s979_s1 + $0x18] sm:$0xff]  ;;  %v22_v5 = vld [vmem:[%s980_s0] sm:$0xff]  ;;  %v23_v8 = vld [vmem:[%s980_s0 + $0x8] sm:$0xff]  ;;  %11 = vst [vmem:[#allocation2] sm:$0x1] %v10_v22 }
   0x3   :  { %v30_v6 = vld [vmem:[%s980_s0 + $0x40] sm:$0xff]  ;;  %v594_v7 = vpack.c.bf16 %v41_v4, %v40_v2  ;;  %566 = vmatprep.mubr.msk.f32.mxu0 %vm49_vm0, %v22_v5  ;;  %v31_v9 = vld [vmem:[%s980_s0 + $0x48] sm:$0xff]  ;;  %v24_v10 = vld [vmem:[%s980_s0 + $0x10] sm:$0xff] }
   0x4   :  { %578 = vmatprep.mubr.msk.f32.mxu1 %vm49_vm0, %v30_v6  ;;  %591 = vmatprep.subr.bf16.mxu0 %v590_v3  ;;  %v32_v11 = vld [vmem:[%s980_s0 + $0x50] sm:$0xff]  ;;  %v25_v12 = vld [vmem:[%s980_s0 + $0x18] sm:$0xff]  ;;  %v26_v14 = vld [vmem:[%s980_s0 + $0x20] sm:$0xff] }
   0x5   :  { %598 = vmatprep.subr.bf16.mxu1 %v590_v3  ;;  %593 = vmatpush3.bf16.msra.mxu0 %v590_v3  ;;  %v33_v13 = vld [vmem:[%s980_s0 + $0x58] sm:$0xff]  ;;  %v34_v15 = vld [vmem:[%s980_s0 + $0x60] sm:$0xff]  ;;  %v27_v16 = vld [vmem:[%s980_s0 + $0x28] sm:$0xff] }
   0x6   :  { %600 = vmatpush3.bf16.msra.mxu1 %v590_v3  ;;  %595 = vmatprep.subr.bf16.mxu0 %v594_v7  ;;  %v35_v17 = vld [vmem:[%s980_s0 + $0x68] sm:$0xff]  ;;  %v28_v18 = vld [vmem:[%s980_s0 + $0x30] sm:$0xff]  ;;  %v29_v20 = vld [vmem:[%s980_s0 + $0x38] sm:$0xff] }
   0x7   :  { %599 = vmatprep.subr.bf16.mxu1 %v594_v7  ;;  %v36_v19 = vld [vmem:[%s980_s0 + $0x70] sm:$0xff]  ;;  %v37_v21 = vld [vmem:[%s980_s0 + $0x78] sm:$0xff]  ;;  %v778_v23 = vld [vmem:[%s982_s2] ss:$0 sm:$0xff] }
   0x8   :  { %v787_v32 = vld [vmem:[%s983_s3] ss:$0 sm:$0xff] }
   0x9   :  { %597 = vmatpush3.bf16.msra.mxu0 %v594_v7 }
   0xa   :  { %601 = vmatpush3.bf16.msra.mxu1 %v594_v7 }
   0xc   :  { %567 = vmatmul.mubr.msk.f32.vlgmr.msra.gmra.mrb[0].mxu0 %vm49_vm0, %v23_v8 }
   0xd   :  { %579 = vmatmul.mubr.msk.f32.vlgmr.msra.gmra.mrb[0].mxu1 %vm49_vm0, %v31_v9  ;;  %569 = vmatprep.mubr.msk.f32.mxu0 %vm49_vm0, %v24_v10 }
   0xe   :  { %581 = vmatprep.mubr.msk.f32.mxu1 %vm49_vm0, %v32_v11 }
  0x10   :  { %570 = vmatmul.mubr.msk.f32.gmra.mrb[2].mxu0 %vm49_vm0, %v25_v12 }
  0x11   :  { %582 = vmatmul.mubr.msk.f32.gmra.mrb[2].mxu1 %vm49_vm0, %v33_v13  ;;  %572 = vmatprep.mubr.msk.f32.mxu0 %vm49_vm0, %v26_v14 }
  0x12   :  { %584 = vmatprep.mubr.msk.f32.mxu1 %vm49_vm0, %v34_v15 }
  0x14   :  { %573 = vmatmul.mubr.msk.f32.gmra.mrb[4].mxu0 %vm49_vm0, %v27_v16 }
  0x15   :  { %585 = vmatmul.mubr.msk.f32.gmra.mrb[4].mxu1 %vm49_vm0, %v35_v17  ;;  %575 = vmatprep.mubr.msk.f32.mxu0 %vm49_vm0, %v28_v18 }
  0x16   :  { %587 = vmatprep.mubr.msk.f32.mxu1 %vm49_vm0, %v36_v19 }
  0x18   :  { %576 = vmatmul.mubr.msk.f32.gmra.mrb[6].mxu0 %vm49_vm0, %v29_v20 }
  0x19   :  { %588 = vmatmul.mubr.msk.f32.gmra.mrb[6].mxu1 %vm49_vm0, %v37_v21 }
  0xdf   :  { %v568_v24 = vpop.f32.mrb[0].mxu0 }
  0xe0   :  { %v580_v25 = vpop.f32.mrb[0].mxu1  ;;  %v170_v26 = vadd.f32 %v568_v24, %v778_v23  ;;  %v164_v28 = vpop.f32.mrb[1].mxu0 }
  0xe1   :  { %v210_v27 = vadd.f32 %v580_v25, %v778_v23  ;;  %v204_v29 = vpop.f32.mrb[1].mxu1  ;;  %v165_v30 = vadd.f32 %v778_v23, %v164_v28 }
  0xe2   :  { %v205_v31 = vadd.f32 %v778_v23, %v204_v29  ;;  %v244_v33 = vmax.f32 %v170_v26, 0.0 }
  0xe3   :  { %v252_v34 = vmax.f32 %v210_v27, 0.0  ;;  %v243_v35 = vmax.f32 %v165_v30, 0.0  ;;  %v571_v36 = vpop.f32.mrb[2].mxu0 }
  0xe4   :  { %v583_v37 = vpop.f32.mrb[2].mxu1  ;;  %v180_v38 = vadd.f32 %v571_v36, %v778_v23  ;;  %v174_v39 = vpop.f32.mrb[3].mxu0  ;;  %v267_v43 = vmul.f32 %v787_v32, %v244_v33  ;;  %v251_v44 = vmax.f32 %v205_v31, 0.0 }
  0xe5   :  { %v220_v40 = vadd.f32 %v583_v37, %v778_v23  ;;  %v275_v41 = vmul.f32 %v787_v32, %v252_v34  ;;  %v214_v42 = vpop.f32.mrb[3].mxu1  ;;  %v175_v45 = vadd.f32 %v778_v23, %v174_v39  ;;  %v266_v47 = vmul.f32 %v787_v32, %v243_v35 }
  0xe6   :  { %v215_v46 = vadd.f32 %v778_v23, %v214_v42  ;;  %v246_v48 = vmax.f32 %v180_v38, 0.0  ;;  %v286_v51 = vsel %vm282_vm1, %v267_v43, 0.0  ;;  %v274_v60 = vmul.f32 %v787_v32, %v251_v44  ;;  %v833_v42 = vld [vmem:[#allocation2] ss:$0 sm:$0xff] }
  0xe7   :  { %v254_v49 = vmax.f32 %v220_v40, 0.0  ;;  %v310_v50 = vsel %vm282_vm1, %v275_v41, 0.0  ;;  %287 = vadd.xlane.f32.xlu0 %v286_v51  ;;  %v574_v52 = vpop.f32.mrb[4].mxu0  ;;  %v245_v61 = vmax.f32 %v175_v45, 0.0  ;;  %v283_v0 = vsel %vm282_vm1, %v266_v47, 0.0 }
  0xe8   :  { %311 = vadd.xlane.f32.xlu1 %v310_v50  ;;  %v586_v53 = vpop.f32.mrb[4].mxu1  ;;  %v269_v54 = vmul.f32 %v787_v32, %v246_v48  ;;  %v190_v55 = vadd.f32 %v574_v52, %v778_v23  ;;  %v184_v56 = vpop.f32.mrb[5].mxu0  ;;  %v253_v62 = vmax.f32 %v215_v46, 0.0  ;;  %v307_v10 = vsel %vm282_vm1, %v274_v60, 0.0 }
  0xe9   :  { %v277_v57 = vmul.f32 %v787_v32, %v254_v49  ;;  %v224_v58 = vpop.f32.mrb[5].mxu1  ;;  %v185_v59 = vadd.f32 %v778_v23, %v184_v56  ;;  %v230_v1 = vadd.f32 %v586_v53, %v778_v23  ;;  %v268_v11 = vmul.f32 %v787_v32, %v245_v61 }
  0xea   :  { %v292_v63 = vsel %vm282_vm1, %v269_v54, 0.0  ;;  %v225_v2 = vadd.f32 %v778_v23, %v224_v58  ;;  %v248_v5 = vmax.f32 %v190_v55, 0.0  ;;  %v276_v12 = vmul.f32 %v787_v32, %v253_v62 }
  0xeb   :  { %284 = vadd.xlane.f32.xlu0 %v283_v0  ;;  %v577_v3 = vpop.f32.mrb[6].mxu0  ;;  %v247_v6 = vmax.f32 %v185_v59, 0.0  ;;  %v316_v7 = vsel %vm282_vm1, %v277_v57, 0.0  ;;  %v256_v13 = vmax.f32 %v230_v1, 0.0  ;;  %v289_v19 = vsel %vm282_vm1, %v268_v11, 0.0 }
  0xec   :  { %293 = vadd.xlane.f32.xlu1 %v292_v63  ;;  %v589_v4 = vpop.f32.mrb[6].mxu1  ;;  %v194_v8 = vpop.f32.mrb[7].mxu0  ;;  %v255_v14 = vmax.f32 %v225_v2, 0.0  ;;  %v200_v15 = vadd.f32 %v577_v3, %v778_v23  ;;  %v271_v17 = vmul.f32 %v787_v32, %v248_v5  ;;  %v313_v20 = vsel %vm282_vm1, %v276_v12, 0.0 }
  0xed   :  { %v234_v9 = vpop.f32.mrb[7].mxu1  ;;  %v195_v16 = vadd.f32 %v778_v23, %v194_v8  ;;  %v270_v18 = vmul.f32 %v787_v32, %v247_v6  ;;  %v240_v21 = vadd.f32 %v589_v4, %v778_v23  ;;  %v279_v24 = vmul.f32 %v787_v32, %v256_v13 }
  0xee   :  { %v235_v22 = vadd.f32 %v778_v23, %v234_v9  ;;  %v278_v25 = vmul.f32 %v787_v32, %v255_v14  ;;  %v250_v26 = vmax.f32 %v200_v15, 0.0  ;;  %v298_v28 = vsel %vm282_vm1, %v271_v17, 0.0 }
  0xef   :  { %308 = vadd.xlane.f32.xlu0 %v307_v10  ;;  %v249_v27 = vmax.f32 %v195_v16, 0.0  ;;  %v295_v29 = vsel %vm282_vm1, %v270_v18, 0.0  ;;  %v258_v30 = vmax.f32 %v240_v21, 0.0  ;;  %v322_v31 = vsel %vm282_vm1, %v279_v24, 0.0 }
  0xf0   :  { %317 = vadd.xlane.f32.xlu1 %v316_v7  ;;  %v257_v33 = vmax.f32 %v235_v22, 0.0  ;;  %v319_v34 = vsel %vm282_vm1, %v278_v25, 0.0  ;;  %v273_v23 = vmul.f32 %v787_v32, %v250_v26 }
  0xf1   :  { %v272_v35 = vmul.f32 %v787_v32, %v249_v27  ;;  %v281_v38 = vmul.f32 %v787_v32, %v258_v30 }
  0xf2   :  { %v304_v36 = vsel %vm282_vm1, %v273_v23, 0.0  ;;  %v280_v39 = vmul.f32 %v787_v32, %v257_v33 }
  0xf3   :  { %314 = vadd.xlane.f32.xlu0 %v313_v20  ;;  %v301_v37 = vsel %vm282_vm1, %v272_v35, 0.0  ;;  %v328_v40 = vsel %vm282_vm1, %v281_v38, 0.0 }
  0xf4   :  { %290 = vadd.xlane.f32.xlu1 %v289_v19  ;;  %v325_v41 = vsel %vm282_vm1, %v280_v39, 0.0 }
  0xf7   :  { %296 = vadd.xlane.f32.xlu0 %v295_v29 }
  0xf8   :  { %299 = vadd.xlane.f32.xlu1 %v298_v28 }
  0xfb   :  { %320 = vadd.xlane.f32.xlu0 %v319_v34 }
  0xfc   :  { %323 = vadd.xlane.f32.xlu1 %v322_v31 }
  0xff   :  { %302 = vadd.xlane.f32.xlu0 %v301_v37 }
 0x100   :  { %305 = vadd.xlane.f32.xlu1 %v304_v36 }
 0x103   :  { %326 = vadd.xlane.f32.xlu0 %v325_v41 }
 0x104   :  { %329 = vadd.xlane.f32.xlu1 %v328_v40 }
 0x174   :  { %v288_v44 = vpop.xlane.xlu0 %287 }
 0x175   :  { %v312_v43 = vpop.xlane.xlu1 %311  ;;  %v839_v46 = vadd.f32 %v833_v42, %v288_v44 }
 0x176   :  { %v836_v45 = vadd.f32 %v833_v42, %v312_v43 }
 0x177   :  { %v371_v47 = vand.u32 2147483647, %v839_v46 }
 0x178   :  { %v379_v32 = vand.u32 2147483647, %v836_v45  ;;  %v285_v49 = vpop.xlane.xlu0 %284 }
 0x179   :  { %v294_v48 = vpop.xlane.xlu1 %293  ;;  %v387_v51 = vsub.f32 0.0, %v371_v47  ;;  %v847_v53 = vadd.f32 %v833_v42, %v285_v49 }
 0x17a   :  { %v395_v50 = vsub.f32 0.0, %v379_v32  ;;  %v844_v52 = vadd.f32 %v833_v42, %v294_v48 }
 0x17b   :  { %v404_v55 = vmul.f32 1.442695, %v387_v51  ;;  %v370_v57 = vand.u32 2147483647, %v847_v53 }
 0x17c   :  { %v420_v54 = vmul.f32 1.442695, %v395_v50  ;;  %v373_v56 = vand.u32 2147483647, %v844_v52  ;;  %v309_v59 = vpop.xlane.xlu0 %308 }
 0x17d   :  { %v318_v58 = vpop.xlane.xlu1 %317  ;;  %v855_v61 = vadd.f32 %v833_v42, %v309_v59  ;;  %v386_v63 = vsub.f32 0.0, %v370_v57 }
 0x17e   :  { %602 = vpow2.f32 %v420_v54  ;;  %v852_v60 = vadd.f32 %v833_v42, %v318_v58  ;;  %v389_v62 = vsub.f32 0.0, %v373_v56 }
 0x17f   :  { %604 = vpow2.f32 %v404_v55  ;;  %v378_v1 = vand.u32 2147483647, %v855_v61  ;;  %v402_v3 = vmul.f32 1.442695, %v386_v63 }
 0x180   :  { %v381_v0 = vand.u32 2147483647, %v852_v60  ;;  %v408_v2 = vmul.f32 1.442695, %v389_v62  ;;  %v315_v5 = vpop.xlane.xlu0 %314 }
 0x181   :  { %v291_v4 = vpop.xlane.xlu1 %290  ;;  %v394_v7 = vsub.f32 0.0, %v378_v1  ;;  %v863_v9 = vadd.f32 %v833_v42, %v315_v5 }
 0x182   :  { %v397_v6 = vsub.f32 0.0, %v381_v0  ;;  %v860_v8 = vadd.f32 %v833_v42, %v291_v4  ;;  %606 = vpow2.f32 %v408_v2 }
 0x183   :  { %608 = vpow2.f32 %v402_v3  ;;  %v418_v11 = vmul.f32 1.442695, %v394_v7  ;;  %v380_v13 = vand.u32 2147483647, %v863_v9  ;;  %v363_v7 = vmax.f32 %v836_v45, 0.0 }
 0x184   :  { %v424_v10 = vmul.f32 1.442695, %v397_v6  ;;  %v372_v12 = vand.u32 2147483647, %v860_v8  ;;  %v297_v15 = vpop.xlane.xlu0 %296 }
 0x185   :  { %v300_v14 = vpop.xlane.xlu1 %299  ;;  %v871_v17 = vadd.f32 %v833_v42, %v297_v15  ;;  %v396_v19 = vsub.f32 0.0, %v380_v13 }
 0x186   :  { %610 = vpow2.f32 %v424_v10  ;;  %v868_v16 = vadd.f32 %v833_v42, %v300_v14  ;;  %v388_v18 = vsub.f32 0.0, %v372_v12 }
 0x187   :  { %612 = vpow2.f32 %v418_v11  ;;  %v374_v22 = vand.u32 2147483647, %v871_v17  ;;  %v422_v27 = vmul.f32 1.442695, %v396_v19 }
 0x188   :  { %v603_v20 = vpop.eup %602  ;;  %v375_v21 = vand.u32 2147483647, %v868_v16  ;;  %v406_v26 = vmul.f32 1.442695, %v388_v18  ;;  %v321_v29 = vpop.xlane.xlu0 %320 }
 0x189   :  { %v605_v24 = vpop.eup %604  ;;  %v443_v25 = vadd.f32 1.0, %v603_v20  ;;  %v324_v28 = vpop.xlane.xlu1 %323  ;;  %v390_v33 = vsub.f32 0.0, %v374_v22  ;;  %v879_v23 = vadd.f32 %v833_v42, %v321_v29 }
 0x18a   :  { %v435_v30 = vadd.f32 1.0, %v605_v24  ;;  %v391_v31 = vsub.f32 0.0, %v375_v21  ;;  %v876_v34 = vadd.f32 %v833_v42, %v324_v28 }
 0x18b   :  { %614 = vlog2.f32 %v443_v25  ;;  %v410_v37 = vmul.f32 1.442695, %v390_v33  ;;  %v382_v39 = vand.u32 2147483647, %v879_v23 }
 0x18c   :  { %616 = vlog2.f32 %v435_v30  ;;  %v412_v35 = vmul.f32 1.442695, %v391_v31  ;;  %v607_v36 = vpop.eup %606  ;;  %v383_v38 = vand.u32 2147483647, %v876_v34  ;;  %v303_v41 = vpop.xlane.xlu0 %302  ;;  %v357_v31 = vmax.f32 %v844_v52, 0.0 }
 0x18d   :  { %618 = vpow2.f32 %v406_v26  ;;  %v306_v40 = vpop.xlane.xlu1 %305  ;;  %v609_v43 = vpop.eup %608  ;;  %v437_v44 = vadd.f32 1.0, %v607_v36  ;;  %v887_v47 = vadd.f32 %v833_v42, %v303_v41  ;;  %v398_v50 = vsub.f32 0.0, %v382_v39 }
 0x18e   :  { %620 = vpow2.f32 %v422_v27  ;;  %v884_v32 = vadd.f32 %v833_v42, %v306_v40  ;;  %v434_v48 = vadd.f32 1.0, %v609_v43  ;;  %v399_v49 = vsub.f32 0.0, %v383_v38 }
 0x18f   :  { %622 = vpow2.f32 %v412_v35  ;;  %v426_v58 = vmul.f32 1.442695, %v398_v50  ;;  %v376_v1 = vand.u32 2147483647, %v887_v47  ;;  %v354_v36 = vmax.f32 %v847_v53, 0.0 }
 0x190   :  { %v611_v51 = vpop.eup %610  ;;  %624 = vlog2.f32 %v437_v44  ;;  %v377_v54 = vand.u32 2147483647, %v884_v32  ;;  %v428_v57 = vmul.f32 1.442695, %v399_v49  ;;  %v327_v62 = vpop.xlane.xlu0 %326  ;;  %v365_v44 = vmax.f32 %v852_v60, 0.0 }
 0x191   :  { %v613_v55 = vpop.eup %612  ;;  %626 = vlog2.f32 %v434_v48  ;;  %v445_v56 = vadd.f32 1.0, %v611_v51  ;;  %v330_v59 = vpop.xlane.xlu1 %329  ;;  %v895_v3 = vadd.f32 %v833_v42, %v327_v62  ;;  %v392_v5 = vsub.f32 0.0, %v376_v1 }
 0x192   :  { %v442_v63 = vadd.f32 1.0, %v613_v55  ;;  %628 = vpow2.f32 %v410_v37  ;;  %v393_v0 = vsub.f32 0.0, %v377_v54  ;;  %v892_v2 = vadd.f32 %v833_v42, %v330_v59 }
 0x193   :  { %630 = vlog2.f32 %v445_v56  ;;  %v414_v13 = vmul.f32 1.442695, %v392_v5  ;;  %v384_v14 = vand.u32 2147483647, %v895_v3  ;;  %v355_v42 = vmax.f32 %v839_v46, 0.0 }
 0x194   :  { %632 = vlog2.f32 %v442_v63  ;;  %v416_v4 = vmul.f32 1.442695, %v393_v0  ;;  %v385_v10 = vand.u32 2147483647, %v892_v2  ;;  %v362_v52 = vmax.f32 %v855_v61, 0.0 }
 0x195   :  { %v615_v6 = vpop.eup %614  ;;  %634 = vpow2.f32 %v428_v57  ;;  %v400_v45 = vsub.f32 0.0, %v384_v14  ;;  %v356_v63 = vmax.f32 %v860_v8, 0.0 }
 0x196   :  { %v617_v11 = vpop.eup %616  ;;  %v469_v12 = vmul.f32 0.6931472, %v615_v6  ;;  %636 = vpow2.f32 %v426_v58  ;;  %v401_v19 = vsub.f32 0.0, %v385_v10  ;;  %v359_v10 = vmax.f32 %v868_v16, 0.0 }
 0x197   :  { %v619_v15 = vpop.eup %618  ;;  %v453_v18 = vmul.f32 0.6931472, %v617_v11  ;;  %638 = vpow2.f32 %v416_v4  ;;  %v430_v29 = vmul.f32 1.442695, %v400_v45  ;;  %v364_v4 = vmax.f32 %v863_v9, 0.0 }
 0x198   :  { %v621_v20 = vpop.eup %620  ;;  %v491_v21 = vadd.f32 %v469_v12, %v363_v7  ;;  %v436_v22 = vadd.f32 1.0, %v619_v15  ;;  %640 = vpow2.f32 %v414_v13  ;;  %v432_v27 = vmul.f32 1.442695, %v401_v19 }
 0x199   :  { %v623_v24 = vpop.eup %622  ;;  %v483_v25 = vadd.f32 %v453_v18, %v355_v42  ;;  %v444_v26 = vadd.f32 1.0, %v621_v20  ;;  %v358_v9 = vmax.f32 %v871_v17, 0.0  ;;  %v366_v17 = vmax.f32 %v879_v23, 0.0 }
 0x19a   :  { %v625_v28 = vpop.eup %624  ;;  %508 = vst.msk [vmem:[%s984_s5 + $0x48] sm:$0xff] %vm498_vm2, %v491_v21  ;;  %642 = vlog2.f32 %v436_v22  ;;  %v439_v46 = vadd.f32 1.0, %v623_v24  ;;  %v367_v21 = vmax.f32 %v876_v34, 0.0 }
 0x19b   :  { %v627_v30 = vpop.eup %626  ;;  %500 = vst.msk [vmem:[%s984_s5 + $0x8] sm:$0xff] %vm498_vm2, %v483_v25  ;;  %v457_v33 = vmul.f32 0.6931472, %v625_v28  ;;  %644 = vlog2.f32 %v444_v26 }
 0x19c   :  { %v629_v35 = vpop.eup %628  ;;  %v451_v37 = vmul.f32 0.6931472, %v627_v30  ;;  %646 = vlog2.f32 %v439_v46 }
 0x19d   :  { %v631_v38 = vpop.eup %630  ;;  %v485_v39 = vadd.f32 %v457_v33, %v357_v31  ;;  %v438_v40 = vadd.f32 1.0, %v629_v35  ;;  %648 = vpow2.f32 %v432_v27  ;;  %v361_v27 = vmax.f32 %v884_v32, 0.0 }
 0x19e   :  { %v633_v41 = vpop.eup %632  ;;  %v482_v43 = vadd.f32 %v451_v37, %v354_v36  ;;  %v473_v48 = vmul.f32 0.6931472, %v631_v38  ;;  %650 = vpow2.f32 %v430_v29  ;;  %v360_v29 = vmax.f32 %v887_v47, 0.0 }
 0x19f   :  { %v635_v49 = vpop.eup %634  ;;  %502 = vst.msk [vmem:[%s984_s5 + $0x18] sm:$0xff] %vm498_vm2, %v485_v39  ;;  %v467_v53 = vmul.f32 0.6931472, %v633_v41  ;;  %652 = vlog2.f32 %v438_v40  ;;  %v369_v31 = vmax.f32 %v892_v2, 0.0  ;;  %v368_v35 = vmax.f32 %v895_v3, 0.0 }
 0x1a0   :  { %v637_v50 = vpop.eup %636  ;;  %499 = vst.msk [vmem:[%s984_s5] sm:$0xff] %vm498_vm2, %v482_v43  ;;  %v493_v51 = vadd.f32 %v473_v48, %v365_v44  ;;  %v447_v60 = vadd.f32 1.0, %v635_v49 }
 0x1a1   :  { %v639_v54 = vpop.eup %638  ;;  %v490_v55 = vadd.f32 %v467_v53, %v362_v52  ;;  %v446_v56 = vadd.f32 1.0, %v637_v50 }
 0x1a2   :  { %v641_v57 = vpop.eup %640  ;;  %510 = vst.msk [vmem:[%s984_s5 + $0x58] sm:$0xff] %vm498_vm2, %v493_v51  ;;  %654 = vlog2.f32 %v447_v60  ;;  %v441_v61 = vadd.f32 1.0, %v639_v54 }
 0x1a3   :  { %507 = vst.msk [vmem:[%s984_s5 + $0x40] sm:$0xff] %vm498_vm2, %v490_v55  ;;  %656 = vlog2.f32 %v446_v56  ;;  %v440_v58 = vadd.f32 1.0, %v641_v57 }
 0x1a4   :  { %v643_v59 = vpop.eup %642  ;;  %658 = vlog2.f32 %v441_v61 }
 0x1a5   :  { %v645_v62 = vpop.eup %644  ;;  %v455_v0 = vmul.f32 0.6931472, %v643_v59  ;;  %660 = vlog2.f32 %v440_v58 }
 0x1a6   :  { %v647_v1 = vpop.eup %646  ;;  %v471_v5 = vmul.f32 0.6931472, %v645_v62 }
 0x1a7   :  { %v649_v6 = vpop.eup %648  ;;  %v484_v7 = vadd.f32 %v455_v0, %v356_v63  ;;  %v461_v11 = vmul.f32 0.6931472, %v647_v1 }
 0x1a8   :  { %v651_v12 = vpop.eup %650  ;;  %v492_v13 = vadd.f32 %v471_v5, %v364_v4  ;;  %v449_v14 = vadd.f32 1.0, %v649_v6 }
 0x1a9   :  { %v653_v15 = vpop.eup %652  ;;  %501 = vst.msk [vmem:[%s984_s5 + $0x10] sm:$0xff] %vm498_vm2, %v484_v7  ;;  %v487_v8 = vadd.f32 %v461_v11, %v359_v10  ;;  %v448_v42 = vadd.f32 1.0, %v651_v12 }
 0x1aa   :  { %509 = vst.msk [vmem:[%s984_s5 + $0x50] sm:$0xff] %vm498_vm2, %v492_v13  ;;  %v459_v16 = vmul.f32 0.6931472, %v653_v15  ;;  %662 = vlog2.f32 %v449_v14 }
 0x1ab   :  { %504 = vst.msk [vmem:[%s984_s5 + $0x28] sm:$0xff] %vm498_vm2, %v487_v8  ;;  %664 = vlog2.f32 %v448_v42 }
 0x1ac   :  { %v655_v18 = vpop.eup %654  ;;  %v486_v19 = vadd.f32 %v459_v16, %v358_v9 }
 0x1ad   :  { %v657_v20 = vpop.eup %656  ;;  %v477_v22 = vmul.f32 0.6931472, %v655_v18 }
 0x1ae   :  { %v659_v45 = vpop.eup %658  ;;  %503 = vst.msk [vmem:[%s984_s5 + $0x20] sm:$0xff] %vm498_vm2, %v486_v19  ;;  %v475_v24 = vmul.f32 0.6931472, %v657_v20 }
 0x1af   :  { %v661_v25 = vpop.eup %660  ;;  %v495_v26 = vadd.f32 %v477_v22, %v367_v21  ;;  %v465_v28 = vmul.f32 0.6931472, %v659_v45 }
 0x1b0   :  { %v494_v46 = vadd.f32 %v475_v24, %v366_v17  ;;  %v463_v30 = vmul.f32 0.6931472, %v661_v25 }
 0x1b1   :  { %512 = vst.msk [vmem:[%s984_s5 + $0x68] sm:$0xff] %vm498_vm2, %v495_v26  ;;  %v489_v34 = vadd.f32 %v465_v28, %v361_v27 }
 0x1b2   :  { %511 = vst.msk [vmem:[%s984_s5 + $0x60] sm:$0xff] %vm498_vm2, %v494_v46  ;;  %v488_v23 = vadd.f32 %v463_v30, %v360_v29 }
 0x1b3   :  { %506 = vst.msk [vmem:[%s984_s5 + $0x38] sm:$0xff] %vm498_vm2, %v489_v34 }
 0x1b4   :  { %v663_v32 = vpop.eup %662  ;;  %505 = vst.msk [vmem:[%s984_s5 + $0x30] sm:$0xff] %vm498_vm2, %v488_v23 }
 0x1b5   :  { %v665_v47 = vpop.eup %664  ;;  %v481_v33 = vmul.f32 0.6931472, %v663_v32 }
 0x1b6   :  { %v479_v36 = vmul.f32 0.6931472, %v665_v47 }
 0x1b7   :  { %v497_v37 = vadd.f32 %v481_v33, %v369_v31 }
 0x1b8   :  { %v496_v38 = vadd.f32 %v479_v36, %v368_v35 }
 0x1b9   :  { %514 = vst.msk [vmem:[%s984_s5 + $0x78] sm:$0xff] %vm498_vm2, %v497_v37 }
 0x1ba   :  { %513 = vst.msk [vmem:[%s984_s5 + $0x70] sm:$0xff] %vm498_vm2, %v496_v38 }

</bundles_post_ra>
